<compile_context>
chip_gen: v5e
topology: v5e:2x2
jax: 0.10.0
libtpu: 0.0.40
codegen_flags: <defaults>
</compile_context>

<pallas_src>
import jax
import jax.numpy as jnp
from jax.experimental import pallas as pl
from jax.experimental.pallas import tpu as pltpu

_LANE = 128
_SUBLANE = 8

# Padded feature widths (lane-dense tiles).
OBS_P = _LANE          # padded obs features; column `obs_size` carries the ones column
HID_P = _LANE          # padded hidden width
ACT_P = _LANE          # padded action width

# Row layout of the single packed parameter slab (shape (_SLAB_ROWS, 128)):
#   rows [0, OBS_P)        : W1 augmented (row `obs_size` holds b1), cols [0, hidden)
#   rows [OBS_P, OBS_P+HID_P): W2, cols [0, n_actions)
#   row  OBS_P+HID_P       : b2, cols [0, n_actions)
_W1_ROW0 = 0
_W2_ROW0 = OBS_P
_B2_ROW0 = OBS_P + HID_P
_SLAB_ROWS = _B2_ROW0 + _SUBLANE   # 264, multiple of 8


def _round_up(n, m):
    return (n + m - 1) // m * m


def _mlp_kernel(x_ref, p_ref, o_ref):
    """One batch tile: (bb, 128) @ (128, 128) -> ReLU -> @ (128, 128) + b2."""
    x = x_ref[...]                                          # (bb, OBS_P), ones col folds b1
    w1 = p_ref[_W1_ROW0:_W1_ROW0 + OBS_P, :]                # (OBS_P, HID_P) augmented
    w2 = p_ref[_W2_ROW0:_W2_ROW0 + HID_P, :]                # (HID_P, ACT_P)
    b2 = p_ref[_B2_ROW0:_B2_ROW0 + 1, :]                    # (1, ACT_P)

    h = jnp.maximum(jnp.dot(x, w1, preferred_element_type=jnp.float32), 0.0)
    out = jnp.dot(h, w2, preferred_element_type=jnp.float32) + b2
    o_ref[...] = out.astype(o_ref.dtype)


def pack_params(w1, b1, w2, b2):
    """Pack (obs,hid) W1, (hid,) b1, (hid,act) W2, (act,) b2 into one f32 slab."""
    obs, hid = w1.shape
    act = w2.shape[1]
    slab = jnp.zeros((_SLAB_ROWS, _LANE), jnp.float32)
    slab = slab.at[:obs, :hid].set(w1.astype(jnp.float32))
    slab = slab.at[obs, :hid].set(b1.astype(jnp.float32))          # b1 folded into W1 row
    slab = slab.at[_W2_ROW0:_W2_ROW0 + hid, :act].set(w2.astype(jnp.float32))
    slab = slab.at[_B2_ROW0, :act].set(b2.astype(jnp.float32))
    return slab


def net_forward(x, w1, b1, w2, b2, *, block_b=256):
    """Forward pass of Net.

    x  : (B, obs_size)        float32
    w1 : (obs_size, hidden)   float32   (PyTorch weight transposed)
    b1 : (hidden,)            float32
    w2 : (hidden, n_actions)  float32   (PyTorch weight transposed)
    b2 : (n_actions,)         float32
    returns (B, n_actions)    float32
    """
    B, obs = x.shape
    hid = w1.shape[1]
    act = w2.shape[1]
    if obs + 1 > OBS_P or hid > HID_P or act > ACT_P:
        raise ValueError("feature sizes exceed padded tile widths")

    # Batch tile: single grid step for tiny batches, 256-row tiles for rollouts.
    bb = min(_round_up(block_b, _SUBLANE), _round_up(max(B, 1), _SUBLANE))
    B_pad = _round_up(max(B, 1), bb)
    grid = (B_pad // bb,)

    # Lane-dense, batch-padded input with the ones column that folds b1.
    x_pad = jnp.zeros((B_pad, OBS_P), jnp.float32)
    x_pad = x_pad.at[:B, :obs].set(x.astype(jnp.float32))
    x_pad = x_pad.at[:, obs].set(1.0)

    slab = pack_params(w1, b1, w2, b2)

    flops = 2 * B_pad * _LANE * (OBS_P + HID_P)
    bytes_accessed = 4 * (B_pad * OBS_P + _SLAB_ROWS * _LANE + B_pad * ACT_P)

    out_pad = pl.pallas_call(
        _mlp_kernel,
        out_shape=jax.ShapeDtypeStruct((B_pad, ACT_P), jnp.float32),
        grid_spec=pltpu.PrefetchScalarGridSpec(
            num_scalar_prefetch=0,
            grid=grid,
            in_specs=[
                # x: one batch tile per grid step.
                pl.BlockSpec((bb, OBS_P), lambda i: (i, 0)),
                # params: same block every step -> DMA'd once, resident in VMEM.
                pl.BlockSpec((_SLAB_ROWS, _LANE), lambda i: (0, 0)),
            ],
            out_specs=pl.BlockSpec((bb, ACT_P), lambda i: (i, 0)),
        ),
        compiler_params=pltpu.CompilerParams(
            dimension_semantics=("parallel",),
        ),
        cost_estimate=pl.CostEstimate(
            flops=flops, transcendentals=0, bytes_accessed=bytes_accessed),
    )(x_pad, slab)

    return out_pad[:B, :act]


def init_params(key, obs_size, hidden_size, n_actions):
    """Deterministic synthetic init (matches PyTorch Linear shapes, transposed)."""
    k1, k2, k3, k4 = jax.random.split(key, 4)
    w1 = jax.random.uniform(k1, (obs_size, hidden_size), jnp.float32, -0.5, 0.5)
    b1 = jax.random.uniform(k2, (hidden_size,), jnp.float32, -0.5, 0.5)
    w2 = jax.random.uniform(k3, (hidden_size, n_actions), jnp.float32, -0.5, 0.5)
    b2 = jax.random.uniform(k4, (n_actions,), jnp.float32, -0.5, 0.5)
    return w1, b1, w2, b2


def _reference(x, w1, b1, w2, b2):
    return jnp.maximum(x @ w1 + b1, 0.0) @ w2 + b2


if __name__ == "__main__":
    # CartPole-like sizes: obs_size=4, hidden=32, n_actions=2.
    obs_size, hidden_size, n_actions = 4, 32, 2

    key = jax.random.PRNGKey(0)
    kx, kp, kx2 = jax.random.split(key, 3)
    w1, b1, w2, b2 = init_params(kp, obs_size, hidden_size, n_actions)

    # Small batch (single grid step).
    batch = 8
    x = jax.random.normal(kx, (batch, obs_size), jnp.float32)
    out = jax.block_until_ready(net_forward(x, w1, b1, w2, b2))
    ref = _reference(x, w1, b1, w2, b2)
    assert out.shape == (batch, n_actions)
    assert jnp.allclose(out, ref, atol=1e-5, rtol=1e-5)

    # Larger "rollout" batch exercising the batch grid (grid > 1, weights resident).
    big_batch = 300
    xb = jax.random.normal(kx2, (big_batch, obs_size), jnp.float32)
    out_b = jax.block_until_ready(net_forward(xb, w1, b1, w2, b2, block_b=128))
    ref_b = _reference(xb, w1, b1, w2, b2)
    assert out_b.shape == (big_batch, n_actions)
    assert jnp.allclose(out_b, ref_b, atol=1e-5, rtol=1e-5)

    print("KERNEL_OK")
</pallas_src>

<mosaic_0001>
module attributes {stable_mosaic.version = 11 : i64} {
  func.func @_mlp_kernel(%arg0: i32, %arg1: memref<8x128xf32, #tpu.memory_space<vmem>>, %arg2: memref<264x128xf32, #tpu.memory_space<vmem>>, %arg3: memref<8x128xf32, #tpu.memory_space<vmem>>) attributes {dimension_semantics = [#tpu.dimension_semantics<parallel>], iteration_bounds = array<i64: 1>, scalar_prefetch = 0 : i64, scratch_operands = 0 : i64, tpu.core_type = #tpu.core_type<tc>, window_params = [{transform_indices = @transform_0, window_bounds = array<i64: 8, 128>}, {pipeline_mode = #tpu.pipeline_mode<synchronous>, transform_indices = @transform_1, window_bounds = array<i64: 264, 128>}, {transform_indices = @transform_2, window_bounds = array<i64: 8, 128>}]} {
    %c0 = arith.constant 0 : index
    %c0_0 = arith.constant 0 : index
    %0 = vector.load %arg1[%c0, %c0_0] : memref<8x128xf32, #tpu.memory_space<vmem>>, vector<8x128xf32>
    %c0_1 = arith.constant 0 : index
    %c0_2 = arith.constant 0 : index
    %1 = vector.load %arg2[%c0_1, %c0_2] : memref<264x128xf32, #tpu.memory_space<vmem>>, vector<128x128xf32>
    %c128 = arith.constant 128 : index
    %c0_3 = arith.constant 0 : index
    %2 = vector.load %arg2[%c128, %c0_3] : memref<264x128xf32, #tpu.memory_space<vmem>>, vector<128x128xf32>
    %c256 = arith.constant 256 : index
    %c0_4 = arith.constant 0 : index
    %3 = vector.load %arg2[%c256, %c0_4] : memref<264x128xf32, #tpu.memory_space<vmem>>, vector<1x128xf32>
    %cst = arith.constant dense<0.000000e+00> : vector<8x128xf32>
    %4 = tpu.matmul %0, %1, %cst {dimension_numbers = #tpu.dot_dimension_numbers<[1], [0], [0], [1], [0, 0, 1, 1], [], []>} : vector<8x128xf32>, vector<128x128xf32>, vector<8x128xf32> -> vector<8x128xf32>
    %cst_5 = arith.constant 0.000000e+00 : f32
    %5 = vector.broadcast %cst_5 : f32 to vector<8x128xf32>
    %6 = arith.maximumf %4, %5 : vector<8x128xf32>
    %cst_6 = arith.constant dense<0.000000e+00> : vector<8x128xf32>
    %7 = tpu.matmul %6, %2, %cst_6 {dimension_numbers = #tpu.dot_dimension_numbers<[1], [0], [0], [1], [0, 0, 1, 1], [], []>} : vector<8x128xf32>, vector<128x128xf32>, vector<8x128xf32> -> vector<8x128xf32>
    %8 = vector.broadcast %3 : vector<1x128xf32> to vector<8x128xf32>
    %9 = arith.addf %7, %8 : vector<8x128xf32>
    %c0_7 = arith.constant 0 : index
    %c0_8 = arith.constant 0 : index
    %10 = vector.load %arg3[%c0_7, %c0_8] : memref<8x128xf32, #tpu.memory_space<vmem>>, vector<8x128xf32>
    tpu.vector_store %arg3[%c0_7, %c0_8], %9 {strides = array<i32>} : memref<8x128xf32, #tpu.memory_space<vmem>>, vector<8x128xf32>,
    return
  }
  func.func @transform_0(%arg0: i32) -> (i32, i32) {
    %c0_i32 = arith.constant 0 : i32
    %c0_i32_0 = arith.constant 0 : i32
    return %arg0, %c0_i32 : i32, i32
  }
  func.func @transform_1(%arg0: i32) -> (i32, i32) {
    %c0_i32 = arith.constant 0 : i32
    %c0_i32_0 = arith.constant 0 : i32
    %c0_i32_1 = arith.constant 0 : i32
    return %c0_i32, %c0_i32_0 : i32, i32
  }
  func.func @transform_2(%arg0: i32) -> (i32, i32) {
    %c0_i32 = arith.constant 0 : i32
    %c0_i32_0 = arith.constant 0 : i32
    return %arg0, %c0_i32 : i32, i32
  }
}

</mosaic_0001>

<bundles_post_ra>
// kernel: tpu_custom_call.1
= control target key start
LH: loop header
LB: loop body
LE: loop exit
PB: predicated region body
PF: predicated region fallthrough
CT: control target
= control target key end

     0   :  { %7 = vsyncpa [#allocation3], 0  ;;  %s250_s0 = inlined_call_operand.hbm [shape: f32[8,128], index: 0, kind: input, shape index: {}]   ;;  %s251_s1 = inlined_call_operand.hbm [shape: f32[264,128], index: 1, kind: input, shape index: {}]   ;;  %s252_s2 = inlined_call_operand.hbm [shape: f32[8,128], index: 2, kind: output, shape index: {}]  }
   0x1   :  { %8 = vsyncpa [#allocation6], 0 }
   0x2   :  { %9 = vsyncpa [#allocation4], 0  ;;  %s15_s11 = sshll.u32 %s250_s0, 4  ;;  %s221_s12 = smov [#allocation2]   ;;  %s16_s11 = int_to_ptr.hbm [resolvable:$true] %s15_s11 }
   0x3   :  { %s17_s13 = sshll.u32 %s221_s12, 4  ;;  %s25_s16 = sshll.u32 %s251_s1, 4  ;;  %s18_s13 = int_to_ptr.vmem [resolvable:$true] %s17_s13  ;;  %s26_s16 = int_to_ptr.hbm [resolvable:$true] %s25_s16 }
   0x4   :  { %20 = dma.hbm_to_vmem [thread:$0]  %s16_s11, 128, %s18_s13, [#allocation3]  }
   0x5   :  { %s222_s17 = smov [#allocation5]   ;;  %s223_s19 = smov 128  }
   0x6   :  { %s27_s18 = sshll.u32 %s222_s17, 4  ;;  %s224_s20 = smov 8   ;;  %s28_s18 = int_to_ptr.vmem [resolvable:$true] %s27_s18 }
   0x7   :  { %33 = dma.hbm_to_vmem [thread:$0]  %s26_s16, 4224, %s28_s18, [#allocation6], %s223_s19, %s223_s19, %s224_s20  }
   0x8   :  { %215 = dma.done.wait [#allocation3], 128  }
   0x9   :  { %216 = vsyncadd [#allocation3], 4294967168 }
   0xa   :  { %217 = dma.done.wait [#allocation6], 4224  }
   0xb   :  { %218 = vsyncadd [#allocation6], 4294963072  ;;  %v58_v0 = vld [vmem:[#allocation5 + $0x78] sm:$0xff]  ;;  %v57_v1 = vld [vmem:[#allocation5 + $0x70] sm:$0xff]  ;;  %s225_s0 = smov [#allocation7]   ;;  %s126_s23 = sshll.u32 %s252_s2, 4  ;;  %s127_s23 = int_to_ptr.hbm [resolvable:$true] %s126_s23 }
   0xc   :  { %76 = vmatpush.msra.mxu0 %v58_v0  ;;  %v56_v2 = vld [vmem:[#allocation5 + $0x68] sm:$0xff]  ;;  %v55_v3 = vld [vmem:[#allocation5 + $0x60] sm:$0xff]  ;;  %v74_v4 = vld [vmem:[#allocation5 + $0xf8] sm:$0xff]  ;;  %s124_s1 = sshll.u32 %s225_s0, 4  ;;  %s125_s1 = int_to_ptr.vmem [resolvable:$true] %s124_s1 }
   0xd   :  { %v54_v5 = vld [vmem:[#allocation5 + $0x58] sm:$0xff]  ;;  %98 = vmatpush.msra.mxu1 %v74_v4  ;;  %v73_v6 = vld [vmem:[#allocation5 + $0xf0] sm:$0xff]  ;;  %v72_v7 = vld [vmem:[#allocation5 + $0xe8] sm:$0xff] }
   0xe   :  { %77 = vmatpush.msra.mxu0 %v57_v1  ;;  %v53_v8 = vld [vmem:[#allocation5 + $0x50] sm:$0xff]  ;;  %v71_v9 = vld [vmem:[#allocation5 + $0xe0] sm:$0xff]  ;;  %v52_v10 = vld [vmem:[#allocation5 + $0x48] sm:$0xff] }
   0xf   :  { %99 = vmatpush.msra.mxu1 %v73_v6  ;;  %v70_v11 = vld [vmem:[#allocation5 + $0xd8] sm:$0xff]  ;;  %v51_v12 = vld [vmem:[#allocation5 + $0x40] sm:$0xff]  ;;  %v69_v13 = vld [vmem:[#allocation5 + $0xd0] sm:$0xff] }
  0x10   :  { %78 = vmatpush.msra.mxu0 %v56_v2  ;;  %v50_v14 = vld [vmem:[#allocation5 + $0x38] sm:$0xff]  ;;  %v68_v15 = vld [vmem:[#allocation5 + $0xc8] sm:$0xff]  ;;  %v49_v16 = vld [vmem:[#allocation5 + $0x30] sm:$0xff] }
  0x11   :  { %100 = vmatpush.msra.mxu1 %v72_v7  ;;  %v67_v17 = vld [vmem:[#allocation5 + $0xc0] sm:$0xff]  ;;  %v48_v18 = vld [vmem:[#allocation5 + $0x28] sm:$0xff]  ;;  %v66_v19 = vld [vmem:[#allocation5 + $0xb8] sm:$0xff] }
  0x12   :  { %79 = vmatpush.msra.mxu0 %v55_v3  ;;  %v47_v20 = vld [vmem:[#allocation5 + $0x20] sm:$0xff]  ;;  %v65_v21 = vld [vmem:[#allocation5 + $0xb0] sm:$0xff]  ;;  %v46_v22 = vld [vmem:[#allocation5 + $0x18] sm:$0xff] }
  0x13   :  { %101 = vmatpush.msra.mxu1 %v71_v9  ;;  %v64_v23 = vld [vmem:[#allocation5 + $0xa8] sm:$0xff]  ;;  %v45_v24 = vld [vmem:[#allocation5 + $0x10] sm:$0xff]  ;;  %v63_v25 = vld [vmem:[#allocation5 + $0xa0] sm:$0xff] }
  0x14   :  { %80 = vmatpush.msra.mxu0 %v54_v5  ;;  %v44_v26 = vld [vmem:[#allocation5 + $0x8] sm:$0xff]  ;;  %v62_v27 = vld [vmem:[#allocation5 + $0x98] sm:$0xff]  ;;  %v43_v28 = vld [vmem:[#allocation5] sm:$0xff] }
  0x15   :  { %102 = vmatpush.msra.mxu1 %v70_v11  ;;  %v42_v29 = vld [vmem:[#allocation2] sm:$0xff]  ;;  %v61_v30 = vld [vmem:[#allocation5 + $0x90] sm:$0xff]  ;;  %v60_v31 = vld [vmem:[#allocation5 + $0x88] sm:$0xff] }
  0x16   :  { %81 = vmatpush.msra.mxu0 %v53_v8  ;;  %v59_v32 = vld [vmem:[#allocation5 + $0x80] sm:$0xff] }
  0x17   :  { %103 = vmatpush.msra.mxu1 %v69_v13  ;;  %v142_v35 = vld [vmem:[#allocation5 + $0x100] ss:$0 sm:$0xff] }
  0x18   :  { %82 = vmatpush.msra.mxu0 %v52_v10 }
  0x19   :  { %104 = vmatpush.msra.mxu1 %v68_v15 }
  0x1a   :  { %83 = vmatpush.msra.mxu0 %v51_v12 }
  0x1b   :  { %105 = vmatpush.msra.mxu1 %v67_v17 }
  0x1c   :  { %84 = vmatpush.msra.mxu0 %v50_v14 }
  0x1d   :  { %106 = vmatpush.msra.mxu1 %v66_v19 }
  0x1e   :  { %85 = vmatpush.msra.mxu0 %v49_v16 }
  0x1f   :  { %107 = vmatpush.msra.mxu1 %v65_v21 }
  0x20   :  { %86 = vmatpush.msra.mxu0 %v48_v18 }
  0x21   :  { %108 = vmatpush.msra.mxu1 %v64_v23 }
  0x22   :  { %87 = vmatpush.msra.mxu0 %v47_v20 }
  0x23   :  { %109 = vmatpush.msra.mxu1 %v63_v25 }
  0x24   :  { %88 = vmatpush.msra.mxu0 %v46_v22 }
  0x25   :  { %110 = vmatpush.msra.mxu1 %v62_v27 }
  0x26   :  { %89 = vmatpush.msra.mxu0 %v45_v24 }
  0x27   :  { %111 = vmatpush.msra.mxu1 %v61_v30 }
  0x28   :  { %90 = vmatpush.msra.mxu0 %v44_v26 }
  0x29   :  { %112 = vmatpush.msra.mxu1 %v60_v31 }
  0x2a   :  { %91 = vmatpush.msra.mxu0 %v43_v28 }
  0x2b   :  { %92 = vmatmul.f32.vlgmr.msra.gmra.mxu0 %v42_v29  ;;  %113 = vmatpush.msra.mxu1 %v59_v32 }
  0xa8   :  { %v93_v33 = vpop.f32.mrf.mxu0 }
  0xa9   :  { %v96_v34 = vmax.f32 %v93_v33, 0.0 }
  0xab   :  { %114 = vmatmul.f32.vlgmr.msra.gmra.mxu1 %v96_v34 }
 0x128   :  { %v115_v36 = vpop.f32.mrf.mxu1 }
 0x129   :  { %v116_v37 = vadd.f32 %v142_v35, %v115_v36 }
 0x12b   :  { %118 = vst [vmem:[#allocation7] sm:$0xff] %v116_v37 }
 0x12c   :  { %129 = dma.vmem_to_hbm [thread:$0]  %s125_s1, 128, %s127_s23, [#allocation4]  }
 0x12d   :  { %219 = dma.done.wait [#allocation4], 128  }
 0x12e   :  { %220 = vsyncadd [#allocation4], 4294967168 }
 0x12f   :  { %134 = vsyncpa [#allocation3], 1 }
 0x130   :  { %135 = vsyncpa [#allocation6], 1 }
 0x131   :  { %136 = vsyncpa [#allocation4], 1 }

</bundles_post_ra>
